<compile_context>
chip_gen: v5e
topology: v5e:2x2
jax: 0.10.0
libtpu: 0.0.40
codegen_flags: <defaults>
</compile_context>

<pallas_src>
import functools

import jax
import jax.numpy as jnp
import numpy as np
from jax.experimental import pallas as pl
from jax.experimental.pallas import tpu as pltpu


def _gaussian(r):
    return jnp.exp(-r)


def _aniso_rbf_kernel(x_ref, lt_ref, clf_ref, selt_ref, wt_ref, o_ref, *,
                      normalization, radial_function):
    x = x_ref[...]                 # (TB, D)    input tile (f32 or bf16)
    lt = lt_ref[...]               # (D, N*D)   lt[e, n*D+d] = L[n, d, e]

    # MXU: project every sample by every L_n at once.
    #   xl[b, n*D+d] = (L_n x_b)_d
    xl = jnp.dot(x, lt, preferred_element_type=jnp.float32)            # (TB, N*D) f32

    # z[b, n*D+d] = (L_n (x_b - c_n))_d   (clf precomputed in the wrapper)
    z = xl - clf_ref[...]                                               # (TB, N*D) f32

    # Block-wise sum over d via selector matmul (MXU) -> squared distances.
    sq = jnp.dot(z * z, selt_ref[...],
                 preferred_element_type=jnp.float32)                    # (TB, N) f32

    # Radial function (EUP for the default Gaussian), kept in f32.
    rbf = radial_function(sq)                                           # (TB, N)

    # Linear combination with the output weights (MXU).
    out = jnp.dot(rbf, wt_ref[...], preferred_element_type=jnp.float32)  # (TB, O)

    if normalization:
        # Per-row normalization commutes with the output matmul -> divide B*O
        # elements instead of B*N; reciprocal uses the EUP path.
        denom = jnp.sum(rbf, axis=-1, keepdims=True) + 1e-9             # (TB, 1)
        out = out * pl.reciprocal(denom, approx=False)

    o_ref[...] = out.astype(o_ref.dtype)


def _round_up(x, m):
    return ((x + m - 1) // m) * m


def anisotropic_rbf_forward(x, centers, weights, L, *, normalization=True,
                            radial_function=_gaussian, matmul_dtype=None,
                            block_b=None):
    """x: (B, D); centers: (N, D); weights: (O, N); L: (N, D, D) -> (B, O)."""
    B, D = x.shape
    N = centers.shape[0]
    O = weights.shape[0]
    out_dtype = x.dtype
    mdt = jnp.dtype(matmul_dtype) if matmul_dtype is not None else jnp.dtype(x.dtype)

    # ---- parameter-only precompute (hoisted out of the hot loop) ------------
    f32 = jnp.float32
    lt = jnp.transpose(L.reshape(N * D, D)).astype(mdt)                  # (D, N*D)
    clf = jnp.einsum('nde,ne->nd', L.astype(f32),
                     centers.astype(f32)).reshape(1, N * D)              # (1, N*D)
    selt = ((jnp.arange(N * D) // D)[:, None]
            == jnp.arange(N)[None, :]).astype(f32)                       # (N*D, N)
    wt = weights.T.astype(f32)                                           # (N, O)

    # ---- batch tiling --------------------------------------------------------
    # ~24 MiB live-data budget (2x-buffered x/out blocks + (TB, N*D) f32 temps),
    # sized to fit comfortably under the v7x 64 MiB VMEM; cap TB at 2048.
    if block_b is None:
        per_row_bytes = 4 * (2 * D + 2 * O + 4 * N * D)
        tb = (24 * 1024 * 1024) // max(per_row_bytes, 1)
        tb = max(16, min(2048, (tb // 16) * 16))
    else:
        tb = max(16, (int(block_b) // 16) * 16)
    tb = min(tb, _round_up(B, 16))          # multiple of 16: safe for f32 & bf16
    b_pad = _round_up(B, tb)

    xp = x.astype(mdt)
    if b_pad != B:
        xp = jnp.pad(xp, ((0, b_pad - B), (0, 0)))

    grid = (b_pad // tb,)

    kernel = functools.partial(_aniso_rbf_kernel,
                               normalization=normalization,
                               radial_function=radial_function)

    flops = 2 * b_pad * (N * D) * D + 2 * b_pad * (N * D) * N + 2 * b_pad * N * O
    bytes_accessed = ((b_pad * D + b_pad * O) * jnp.dtype(out_dtype).itemsize
                      + (D * N * D) * mdt.itemsize
                      + (N * D + N * D * N + N * O) * 4)
    cost = pl.CostEstimate(flops=flops, transcendentals=b_pad * N,
                           bytes_accessed=bytes_accessed)

    out = pl.pallas_call(
        kernel,
        out_shape=jax.ShapeDtypeStruct((b_pad, O), out_dtype),
        grid_spec=pltpu.PrefetchScalarGridSpec(
            num_scalar_prefetch=0,
            grid=grid,
            in_specs=[
                pl.BlockSpec((tb, D), lambda i: (i, 0)),       # x tile (streamed)
                pl.BlockSpec((D, N * D), lambda i: (0, 0)),    # L^T   (resident)
                pl.BlockSpec((1, N * D), lambda i: (0, 0)),    # clf   (resident)
                pl.BlockSpec((N * D, N), lambda i: (0, 0)),    # selt  (resident)
                pl.BlockSpec((N, O), lambda i: (0, 0)),        # W^T   (resident)
            ],
            out_specs=pl.BlockSpec((tb, O), lambda i: (i, 0)),
        ),
        compiler_params=pltpu.CompilerParams(
            dimension_semantics=("parallel",),
            vmem_limit_bytes=48 * 1024 * 1024,
        ),
        cost_estimate=cost,
    )(xp, lt, clf, selt, wt)

    return out[:B]


if __name__ == "__main__":
    B, D, N, O = 16, 32, 8, 8   # batch, in_features_dim, num_kernels, out_features_dim

    key = jax.random.PRNGKey(0)
    k_x, k_c, k_w, k_l = jax.random.split(key, 4)

    # Deterministic parameter init mirroring the module's __init__/reset_parameters:
    x = jax.random.normal(k_x, (B, D), dtype=jnp.float32)
    centers = jax.random.uniform(k_c, (N, D), minval=-1.0, maxval=1.0, dtype=jnp.float32)
    bound = float(np.sqrt(6.0 / (N + O)))   # xavier_uniform, gain=1
    weights = jax.random.uniform(k_w, (O, N), minval=-bound, maxval=bound, dtype=jnp.float32)
    # L: identity-like with a deterministic anisotropic perturbation (as if initial_L given)
    L = 0.2 * jnp.tile(jnp.eye(D, dtype=jnp.float32)[None], (N, 1, 1)) \
        + 0.05 * jax.random.normal(k_l, (N, D, D), dtype=jnp.float32)

    # Pure-JAX reference mirroring the PyTorch forward exactly.
    def reference(xx):
        diff = xx[:, None, :] - centers[None, :, :]                # (B, N, D)
        z = jnp.einsum('nde,bne->bnd', L, diff)                    # (B, N, D)
        sq = jnp.sum(z ** 2, axis=-1)                              # (B, N)
        rbf = jnp.exp(-sq)                                         # phi = Gaussian
        rbf = rbf / (jnp.sum(rbf, axis=-1, keepdims=True) + 1e-9)  # normalization
        return jnp.einsum('bn,on->bo', rbf, weights)               # (B, O)

    # 1) f32 path, single tile — strict parity with the PyTorch forward.
    out = jax.block_until_ready(anisotropic_rbf_forward(x, centers, weights, L))
    np.testing.assert_allclose(np.asarray(out), np.asarray(reference(x)),
                               rtol=1e-4, atol=1e-5)

    # 2) f32 path with a multi-step batch grid (padding + pipelining exercised).
    Bb = 300
    xb = jax.random.normal(jax.random.PRNGKey(1), (Bb, D), dtype=jnp.float32)
    out_b = jax.block_until_ready(
        anisotropic_rbf_forward(xb, centers, weights, L, block_b=64))
    np.testing.assert_allclose(np.asarray(out_b), np.asarray(reference(xb)),
                               rtol=1e-4, atol=1e-5)

    # 3) bf16 MXU operands (f32 accumulation, f32 exp/normalization) — perf mode.
    out_bf16 = jax.block_until_ready(
        anisotropic_rbf_forward(x, centers, weights, L, matmul_dtype=jnp.bfloat16))
    np.testing.assert_allclose(np.asarray(out_bf16), np.asarray(reference(x)),
                               rtol=1e-1, atol=2e-2)

    print("KERNEL_OK")
</pallas_src>

<mosaic_0001>
module attributes {stable_mosaic.version = 11 : i64} {
  func.func @_aniso_rbf_kernel(%arg0: i32, %arg1: memref<16x32xf32, #tpu.memory_space<vmem>>, %arg2: memref<32x256xf32, #tpu.memory_space<vmem>>, %arg3: memref<1x256xf32, #tpu.memory_space<vmem>>, %arg4: memref<256x8xf32, #tpu.memory_space<vmem>>, %arg5: memref<8x8xf32, #tpu.memory_space<vmem>>, %arg6: memref<16x8xf32, #tpu.memory_space<vmem>>) attributes {dimension_semantics = [#tpu.dimension_semantics<parallel>], iteration_bounds = array<i64: 1>, scalar_prefetch = 0 : i64, scratch_operands = 0 : i64, tpu.core_type = #tpu.core_type<tc>, window_params = [{transform_indices = @transform_0, window_bounds = array<i64: 16, 32>}, {pipeline_mode = #tpu.pipeline_mode<synchronous>, transform_indices = @transform_1, window_bounds = array<i64: 32, 256>}, {pipeline_mode = #tpu.pipeline_mode<synchronous>, transform_indices = @transform_2, window_bounds = array<i64: 1, 256>}, {pipeline_mode = #tpu.pipeline_mode<synchronous>, transform_indices = @transform_3, window_bounds = array<i64: 256, 8>}, {pipeline_mode = #tpu.pipeline_mode<synchronous>, transform_indices = @transform_4, window_bounds = array<i64: 8, 8>}, {transform_indices = @transform_5, window_bounds = array<i64: 16, 8>}]} {
    %c0 = arith.constant 0 : index
    %c0_0 = arith.constant 0 : index
    %0 = vector.load %arg1[%c0, %c0_0] : memref<16x32xf32, #tpu.memory_space<vmem>>, vector<16x32xf32>
    %c0_1 = arith.constant 0 : index
    %c0_2 = arith.constant 0 : index
    %1 = vector.load %arg2[%c0_1, %c0_2] : memref<32x256xf32, #tpu.memory_space<vmem>>, vector<32x256xf32>
    %cst = arith.constant dense<0.000000e+00> : vector<16x256xf32>
    %2 = tpu.matmul %0, %1, %cst {dimension_numbers = #tpu.dot_dimension_numbers<[1], [0], [0], [1], [0, 0, 1, 1], [], []>} : vector<16x32xf32>, vector<32x256xf32>, vector<16x256xf32> -> vector<16x256xf32>
    %c0_3 = arith.constant 0 : index
    %c0_4 = arith.constant 0 : index
    %3 = vector.load %arg3[%c0_3, %c0_4] : memref<1x256xf32, #tpu.memory_space<vmem>>, vector<1x256xf32>
    %4 = vector.broadcast %3 : vector<1x256xf32> to vector<16x256xf32>
    %5 = arith.subf %2, %4 : vector<16x256xf32>
    %6 = arith.mulf %5, %5 : vector<16x256xf32>
    %c0_5 = arith.constant 0 : index
    %c0_6 = arith.constant 0 : index
    %7 = vector.load %arg4[%c0_5, %c0_6] : memref<256x8xf32, #tpu.memory_space<vmem>>, vector<256x8xf32>
    %cst_7 = arith.constant dense<0.000000e+00> : vector<16x8xf32>
    %8 = tpu.matmul %6, %7, %cst_7 {dimension_numbers = #tpu.dot_dimension_numbers<[1], [0], [0], [1], [0, 0, 1, 1], [], []>} : vector<16x256xf32>, vector<256x8xf32>, vector<16x8xf32> -> vector<16x8xf32>
    %cst_8 = arith.constant 0.000000e+00 : f32
    %9 = vector.broadcast %cst_8 : f32 to vector<16x8xf32>
    %10 = arith.subf %9, %8 : vector<16x8xf32>
    %11 = math.exp %10 : vector<16x8xf32>
    %c0_9 = arith.constant 0 : index
    %c0_10 = arith.constant 0 : index
    %12 = vector.load %arg5[%c0_9, %c0_10] : memref<8x8xf32, #tpu.memory_space<vmem>>, vector<8x8xf32>
    %cst_11 = arith.constant dense<0.000000e+00> : vector<16x8xf32>
    %13 = tpu.matmul %11, %12, %cst_11 {dimension_numbers = #tpu.dot_dimension_numbers<[1], [0], [0], [1], [0, 0, 1, 1], [], []>} : vector<16x8xf32>, vector<8x8xf32>, vector<16x8xf32> -> vector<16x8xf32>
    %cst_12 = arith.constant dense<0.000000e+00> : vector<16xf32>
    %14 = vector.multi_reduction <add>, %11, %cst_12 [1] : vector<16x8xf32> to vector<16xf32>
    %15 = vector.shape_cast %14 : vector<16xf32> to vector<16x1xf32>
    %cst_13 = arith.constant 9.99999971E-10 : f32
    %16 = vector.broadcast %cst_13 : f32 to vector<16x1xf32>
    %17 = arith.addf %15, %16 : vector<16x1xf32>
    %18 = tpu.reciprocal %17 : vector<16x1xf32> -> vector<16x1xf32>
    %19 = vector.broadcast %18 : vector<16x1xf32> to vector<16x8xf32>
    %20 = arith.mulf %13, %19 : vector<16x8xf32>
    %c0_14 = arith.constant 0 : index
    %c0_15 = arith.constant 0 : index
    %21 = vector.load %arg6[%c0_14, %c0_15] : memref<16x8xf32, #tpu.memory_space<vmem>>, vector<16x8xf32>
    tpu.vector_store %arg6[%c0_14, %c0_15], %20 {strides = array<i32>} : memref<16x8xf32, #tpu.memory_space<vmem>>, vector<16x8xf32>,
    return
  }
  func.func @transform_0(%arg0: i32) -> (i32, i32) {
    %c0_i32 = arith.constant 0 : i32
    %c0_i32_0 = arith.constant 0 : i32
    return %arg0, %c0_i32 : i32, i32
  }
  func.func @transform_1(%arg0: i32) -> (i32, i32) {
    %c0_i32 = arith.constant 0 : i32
    %c0_i32_0 = arith.constant 0 : i32
    %c0_i32_1 = arith.constant 0 : i32
    return %c0_i32, %c0_i32_0 : i32, i32
  }
  func.func @transform_2(%arg0: i32) -> (i32, i32) {
    %c0_i32 = arith.constant 0 : i32
    %c0_i32_0 = arith.constant 0 : i32
    %c0_i32_1 = arith.constant 0 : i32
    return %c0_i32, %c0_i32_0 : i32, i32
  }
  func.func @transform_3(%arg0: i32) -> (i32, i32) {
    %c0_i32 = arith.constant 0 : i32
    %c0_i32_0 = arith.constant 0 : i32
    %c0_i32_1 = arith.constant 0 : i32
    return %c0_i32, %c0_i32_0 : i32, i32
  }
  func.func @transform_4(%arg0: i32) -> (i32, i32) {
    %c0_i32 = arith.constant 0 : i32
    %c0_i32_0 = arith.constant 0 : i32
    %c0_i32_1 = arith.constant 0 : i32
    return %c0_i32, %c0_i32_0 : i32, i32
  }
  func.func @transform_5(%arg0: i32) -> (i32, i32) {
    %c0_i32 = arith.constant 0 : i32
    %c0_i32_0 = arith.constant 0 : i32
    return %arg0, %c0_i32 : i32, i32
  }
}

</mosaic_0001>

<bundles_post_ra>
// kernel: tpu_custom_call.1
= control target key start
LH: loop header
LB: loop body
LE: loop exit
PB: predicated region body
PF: predicated region fallthrough
CT: control target
= control target key end

     0   :  { %vm30_vm0 = vcmask 261120   ;;  %vm182_vm1 = vcmask 64512   ;;  %s448_s1 = inlined_call_operand.vmem [shape: f32[32,256], index: 1, kind: input, shape index: {}]   ;;  %s449_s3 = inlined_call_operand.vmem [shape: f32[256,8], index: 3, kind: input, shape index: {}]   ;;  %s450_s0 = inlined_call_operand.vmem [shape: f32[16,32], index: 0, kind: input, shape index: {}]   ;;  %s451_s2 = inlined_call_operand.vmem [shape: f32[1,256], index: 2, kind: input, shape index: {}]   ;;  %s452_s4 = inlined_call_operand.vmem [shape: f32[8,8], index: 4, kind: input, shape index: {}]   ;;  %s453_s5 = inlined_call_operand.vmem [shape: f32[16,8], index: 5, kind: output, shape index: {}]  }
   0x1   :  { %v28_v0 = vld [vmem:[%s448_s1 + $0x30] sm:$0xff]  ;;  %v29_v1 = vld [vmem:[%s448_s1 + $0x38] sm:$0xff]  ;;  %v26_v2 = vld [vmem:[%s448_s1 + $0x20] sm:$0xff] }
   0x2   :  { %49 = vmatpush.msra.mxu0 %v28_v0  ;;  %72 = vmatpush.msra.mxu1 %v29_v1  ;;  %v27_v3 = vld [vmem:[%s448_s1 + $0x28] sm:$0xff]  ;;  %v24_v4 = vld [vmem:[%s448_s1 + $0x10] sm:$0xff]  ;;  %v25_v5 = vld [vmem:[%s448_s1 + $0x18] sm:$0xff] }
   0x3   :  { %v22_v6 = vld [vmem:[%s448_s1] sm:$0xff]  ;;  %v112_v7 = vld [vmem:[%s449_s3 + $0x78] sm:$0xff]  ;;  %v23_v9 = vld [vmem:[%s448_s1 + $0x8] sm:$0xff] }
   0x4   :  { %50 = vmatpush.msra.mxu0 %v26_v2  ;;  %73 = vmatpush.msra.mxu1 %v27_v3  ;;  %v128_v8 = vld [vmem:[%s449_s3 + $0xf8] sm:$0xff]  ;;  %v111_v10 = vld [vmem:[%s449_s3 + $0x70] sm:$0xff]  ;;  %v20_v12 = vld [vmem:[%s450_s0] sm:$0xff] }
   0x5   :  { %129 = vmatpush.msra.mxu2 %v112_v7  ;;  %152 = vmatpush.msra.mxu3 %v128_v8  ;;  %v127_v11 = vld [vmem:[%s449_s3 + $0xf0] sm:$0xff]  ;;  %v110_v13 = vld [vmem:[%s449_s3 + $0x68] sm:$0xff]  ;;  %v109_v15 = vld [vmem:[%s449_s3 + $0x60] sm:$0xff] }
   0x6   :  { %51 = vmatpush.msra.mxu0 %v24_v4  ;;  %74 = vmatpush.msra.mxu1 %v25_v5  ;;  %v126_v14 = vld [vmem:[%s449_s3 + $0xe8] sm:$0xff]  ;;  %v125_v16 = vld [vmem:[%s449_s3 + $0xe0] sm:$0xff]  ;;  %v108_v17 = vld [vmem:[%s449_s3 + $0x58] sm:$0xff] }
   0x7   :  { %130 = vmatpush.msra.mxu2 %v111_v10  ;;  %153 = vmatpush.msra.mxu3 %v127_v11  ;;  %v124_v18 = vld [vmem:[%s449_s3 + $0xd8] sm:$0xff]  ;;  %v107_v19 = vld [vmem:[%s449_s3 + $0x50] sm:$0xff]  ;;  %v21_v21 = vld [vmem:[%s450_s0 + $0x8] sm:$0xff] }
   0x8   :  { %52 = vmatpush.msra.mxu0 %v22_v6  ;;  %75 = vmatpush.msra.mxu1 %v23_v9  ;;  %v123_v20 = vld [vmem:[%s449_s3 + $0xd0] sm:$0xff]  ;;  %v106_v22 = vld [vmem:[%s449_s3 + $0x48] sm:$0xff]  ;;  %v105_v24 = vld [vmem:[%s449_s3 + $0x40] sm:$0xff] }
   0x9   :  { %256 = vmatmul.msk.f32.vlgmr.msra.gmra.mxu0 %vm30_vm0, %v20_v12  ;;  %258 = vmatmul.msk.f32.vlgmr.msra.gmra.mxu1 %vm30_vm0, %v20_v12  ;;  %v122_v23 = vld [vmem:[%s449_s3 + $0xc8] sm:$0xff]  ;;  %v121_v25 = vld [vmem:[%s449_s3 + $0xc0] sm:$0xff]  ;;  %v104_v26 = vld [vmem:[%s449_s3 + $0x38] sm:$0xff] }
   0xa   :  { %131 = vmatpush.msra.mxu2 %v110_v13  ;;  %154 = vmatpush.msra.mxu3 %v126_v14  ;;  %v120_v27 = vld [vmem:[%s449_s3 + $0xb8] sm:$0xff]  ;;  %v103_v28 = vld [vmem:[%s449_s3 + $0x30] sm:$0xff]  ;;  %v102_v30 = vld [vmem:[%s449_s3 + $0x28] sm:$0xff] }
   0xb   :  { %v119_v29 = vld [vmem:[%s449_s3 + $0xb0] sm:$0xff]  ;;  %v118_v31 = vld [vmem:[%s449_s3 + $0xa8] sm:$0xff]  ;;  %v101_v32 = vld [vmem:[%s449_s3 + $0x20] sm:$0xff] }
   0xc   :  { %132 = vmatpush.msra.mxu2 %v109_v15  ;;  %155 = vmatpush.msra.mxu3 %v125_v16  ;;  %v117_v33 = vld [vmem:[%s449_s3 + $0xa0] sm:$0xff]  ;;  %v100_v34 = vld [vmem:[%s449_s3 + $0x18] sm:$0xff]  ;;  %v99_v36 = vld [vmem:[%s449_s3 + $0x10] sm:$0xff] }
   0xd   :  { %v116_v35 = vld [vmem:[%s449_s3 + $0x98] sm:$0xff]  ;;  %v115_v37 = vld [vmem:[%s449_s3 + $0x90] sm:$0xff]  ;;  %v98_v38 = vld [vmem:[%s449_s3 + $0x8] sm:$0xff] }
   0xe   :  { %133 = vmatpush.msra.mxu2 %v108_v17  ;;  %156 = vmatpush.msra.mxu3 %v124_v18  ;;  %v114_v39 = vld [vmem:[%s449_s3 + $0x88] sm:$0xff]  ;;  %v97_v40 = vld [vmem:[%s449_s3] sm:$0xff] }
   0xf   :  { %v113_v41 = vld [vmem:[%s449_s3 + $0x80] sm:$0xff] }
  0x10   :  { %134 = vmatpush.msra.mxu2 %v107_v19  ;;  %157 = vmatpush.msra.mxu3 %v123_v20  ;;  %v83_v42 = vld [vmem:[%s451_s2] sm:$0x3] }
  0x11   :  { %257 = vmatmul.msk.f32.gmra.mxu0 %vm30_vm0, %v21_v21  ;;  %259 = vmatmul.msk.f32.gmra.mxu1 %vm30_vm0, %v21_v21  ;;  %v85_v43 = vperm.slane %v83_v42, 0  ;;  %v86_v44 = vperm.slane %v83_v42, 1  ;;  %v181_v57 = vld [vmem:[%s452_s4] sm:$0xff] }
  0x12   :  { %135 = vmatpush.msra.mxu2 %v106_v22  ;;  %158 = vmatpush.msra.mxu3 %v122_v23 }
  0x13   :  { %204 = vmatpush.msrb.mxu0 %v181_v57 }
  0x14   :  { %136 = vmatpush.msra.mxu2 %v105_v24  ;;  %159 = vmatpush.msra.mxu3 %v121_v25 }
  0x16   :  { %137 = vmatpush.msra.mxu2 %v104_v26  ;;  %160 = vmatpush.msra.mxu3 %v120_v27 }
  0x18   :  { %138 = vmatpush.msra.mxu2 %v103_v28  ;;  %161 = vmatpush.msra.mxu3 %v119_v29 }
  0x1a   :  { %139 = vmatpush.msra.mxu2 %v102_v30  ;;  %162 = vmatpush.msra.mxu3 %v118_v31 }
  0x1c   :  { %140 = vmatpush.msra.mxu2 %v101_v32  ;;  %163 = vmatpush.msra.mxu3 %v117_v33 }
  0x1e   :  { %141 = vmatpush.msra.mxu2 %v100_v34  ;;  %164 = vmatpush.msra.mxu3 %v116_v35 }
  0x20   :  { %142 = vmatpush.msra.mxu2 %v99_v36  ;;  %165 = vmatpush.msra.mxu3 %v115_v37 }
  0x22   :  { %143 = vmatpush.msra.mxu2 %v98_v38  ;;  %166 = vmatpush.msra.mxu3 %v114_v39 }
  0x24   :  { %144 = vmatpush.msra.mxu2 %v97_v40  ;;  %167 = vmatpush.msra.mxu3 %v113_v41 }
  0x86   :  { %v54_v45 = vpop.f32.mrf.mxu0  ;;  %v77_v46 = vpop.f32.mrf.mxu1 }
  0x87   :  { %v89_v47 = vsub.f32 %v54_v45, %v85_v43  ;;  %v90_v48 = vsub.f32 %v77_v46, %v86_v44 }
  0x89   :  { %v93_v49 = vmul.f32 %v89_v47, %v89_v47  ;;  %v94_v50 = vmul.f32 %v90_v48, %v90_v48 }
  0x8b   :  { %145 = vmatmul.f32.vlgmr.msra.gmra.mxu2 %v93_v49  ;;  %168 = vmatmul.f32.vlgmr.msra.gmra.mxu3 %v94_v50 }
  0x8e   :  { %v57_v51 = vpop.f32.mrf.mxu0  ;;  %v80_v52 = vpop.f32.mrf.mxu1 }
  0x8f   :  { %v91_v53 = vsub.f32 %v57_v51, %v85_v43  ;;  %v92_v54 = vsub.f32 %v80_v52, %v86_v44 }
  0x91   :  { %v95_v55 = vmul.f32 %v91_v53, %v91_v53  ;;  %v96_v56 = vmul.f32 %v92_v54, %v92_v54 }
  0x93   :  { %148 = vmatmul.f32.gmra.mxu2 %v95_v55  ;;  %171 = vmatmul.f32.gmra.mxu3 %v96_v56 }
 0x10e   :  { %v146_v58 = vpop.f32.mrf.mxu2  ;;  %v169_v59 = vpop.f32.mrf.mxu3 }
 0x10f   :  { %v170_v60 = vadd.f32 %v169_v59, %v146_v58 }
 0x111   :  { %v175_v61 = vsub.f32 0.0, %v170_v60 }
 0x113   :  { %v177_v62 = vmul.f32 1.442695, %v175_v61 }
 0x115   :  { %262 = vpow2.f32 %v177_v62 }
 0x116   :  { %v149_v63 = vpop.f32.mrf.mxu2  ;;  %v172_v0 = vpop.f32.mrf.mxu3 }
 0x117   :  { %v173_v1 = vadd.f32 %v172_v0, %v149_v63 }
 0x119   :  { %v176_v2 = vsub.f32 0.0, %v173_v1 }
 0x11b   :  { %v263_v3 = vpop.eup %262  ;;  %v179_v4 = vmul.f32 1.442695, %v176_v2 }
 0x11c   :  { %260 = vmatmul.msk.f32.vlgmr.msrb.gmra.mxu0 %vm182_vm1, %v263_v3  ;;  %v212_v5 = vsel %vm182_vm1, %v263_v3, 0.0 }
 0x11d   :  { %264 = vpow2.f32 %v179_v4  ;;  %213 = vadd.xlane.f32.xlu0 %v212_v5 }
 0x123   :  { %v265_v6 = vpop.eup %264 }
 0x124   :  { %261 = vmatmul.msk.f32.gmra.mxu0 %vm182_vm1, %v265_v6  ;;  %v215_v7 = vsel %vm182_vm1, %v265_v6, 0.0 }
 0x125   :  { %216 = vadd.xlane.f32.xlu0 %v215_v7 }
 0x190   :  { %v214_v8 = vpop.xlane.xlu0 %213 }
 0x191   :  { %v218_v9 = vadd.f32 1e-09, %v214_v8 }
 0x193   :  { %266 = vrcp.f32 %v218_v9  ;;  %v231_v15 = vand.u32 2147483648, %v218_v9  ;;  %v229_v17 = vand.u32 2147483647, %v218_v9  ;;  %vm225_vm3 = vweird.f32 %v218_v9 }
 0x195   :  { %v232_v21 = vor.u32 1.1754944e-38, %v231_v15  ;;  %vm230_vm5 = vcmp.eq.f32.partialorder %v229_v17, 8.507059e+37 }
 0x198   :  { %v217_v10 = vpop.xlane.xlu0 %216 }
 0x199   :  { %v267_v11 = vpop.eup %266  ;;  %v219_v12 = vadd.f32 1e-09, %v217_v10  ;;  %v206_v20 = vpop.f32.mrf.mxu0 }
 0x19a   :  { %v221_v13 = vmul.f32 %v267_v11, %v218_v9  ;;  %vm226_vm2 = vweird.f32 %v267_v11 }
 0x19b   :  { %268 = vrcp.f32 %v219_v12  ;;  %vm227_vm4 = vmor %vm225_vm3, %vm226_vm2  ;;  %v245_v27 = vand.u32 2147483648, %v219_v12  ;;  %v243_v29 = vand.u32 2147483647, %v219_v12  ;;  %vm239_vm7 = vweird.f32 %v219_v12 }
 0x19c   :  { %v222_v14 = vsub.f32 1.0, %v221_v13 }
 0x19d   :  { %v246_v31 = vor.u32 1.1754944e-38, %v245_v27  ;;  %vm244_vm9 = vcmp.eq.f32.partialorder %v243_v29, 8.507059e+37 }
 0x19e   :  { %v223_v16 = vmul.f32 %v267_v11, %v222_v14 }
 0x1a0   :  { %v224_v18 = vadd.f32 %v267_v11, %v223_v16 }
 0x1a1   :  { %v269_v19 = vpop.eup %268  ;;  %v209_v33 = vpop.f32.mrf.mxu0 }
 0x1a2   :  { %v235_v22 = vmul.f32 %v269_v19, %v219_v12  ;;  %v228_v23 = vsel %vm227_vm4, %v267_v11, %v224_v18  ;;  %vm240_vm6 = vweird.f32 %v269_v19 }
 0x1a3   :  { %v233_v24 = vsel %vm230_vm5, %v232_v21, %v228_v23  ;;  %vm241_vm8 = vmor %vm239_vm7, %vm240_vm6 }
 0x1a4   :  { %v248_v25 = vmul.f32 %v233_v24, %v206_v20  ;;  %v236_v26 = vsub.f32 1.0, %v235_v22 }
 0x1a6   :  { %250 = vst.msk [vmem:[%s453_s5] sm:$0xff] %vm182_vm1, %v248_v25  ;;  %v237_v28 = vmul.f32 %v269_v19, %v236_v26 }
 0x1a8   :  { %v238_v30 = vadd.f32 %v269_v19, %v237_v28 }
 0x1aa   :  { %v242_v32 = vsel %vm241_vm8, %v269_v19, %v238_v30 }
 0x1ab   :  { %v247_v34 = vsel %vm244_vm9, %v246_v31, %v242_v32 }
 0x1ac   :  { %v249_v35 = vmul.f32 %v247_v34, %v209_v33 }
 0x1ae   :  { %251 = vst.msk [vmem:[%s453_s5 + $0x8] sm:$0xff] %vm182_vm1, %v249_v35 }

</bundles_post_ra>
